<compile_context>
chip_gen: v7x
topology: tpu7x:2x2x1
jax: 0.10.0
libtpu: 0.0.40
codegen_flags: <defaults>
</compile_context>

<pallas_src>
import functools
import math

import jax
import jax.numpy as jnp
from jax.experimental import pallas as pl
from jax.experimental.pallas import tpu as pltpu


def _attention_fusion_kernel(x_ref, o_ref, *, n_agents, feat_dim, inv_scale,
                             hw, tile, ragged):
    # x_ref: (N*C, T)  agents*channels on sublanes, spatial tile T on lanes.
    C = feat_dim

    if ragged:
        # Last block overhangs HW: zero out-of-bounds lanes so garbage never
        # reaches exp/accumulate (Pallas drops the out-of-bounds stores).
        col = (jax.lax.broadcasted_iota(jnp.int32, (1, tile), 1)
               + pl.program_id(0) * tile)
        valid = col < hw

    def agent(m):
        v = x_ref[m * C:(m + 1) * C, :].astype(jnp.float32)   # (C, T)
        if ragged:
            v = jnp.where(valid, v, 0.0)
        return v

    x0 = agent(0)

    # Pass 1: score row 0 only, one (1,T) row per key agent, running max.
    scores = []
    run_max = None
    for m in range(n_agents):
        xm = x0 if m == 0 else agent(m)
        s = jnp.sum(x0 * xm, axis=0, keepdims=True) * inv_scale   # (1, T)
        scores.append(s)
        run_max = s if run_max is None else jnp.maximum(run_max, s)

    # Pass 2: exp rows -> running denominator and context accumulation.
    denom = None
    ctx = None
    for m in range(n_agents):
        p = jnp.exp(scores[m] - run_max)                          # (1, T)
        denom = p if denom is None else denom + p
        xm = x0 if m == 0 else agent(m)                           # cheap re-slice
        contrib = p * xm                                          # (C, T)
        ctx = contrib if ctx is None else ctx + contrib

    # Exact reciprocal (one (1,T) divide per tile) for reference parity.
    ctx = ctx * (1.0 / denom)
    o_ref[...] = ctx.astype(o_ref.dtype)


def attention_fusion(x, *, vmem_budget_bytes=24 * 1024 * 1024):
    """x: (cav_num, C, H, W) -> (C, H, W), matching AttentionFusion.forward."""
    N, C, H, W = x.shape
    HW = H * W
    xf = x.reshape(N * C, HW)
    itemsize = jnp.dtype(x.dtype).itemsize

    # ---- tile selection: lane-dense, sized against VMEM (I/O + temporaries) ----
    rows_in, rows_out = N * C, C
    rows_tmp_f32 = 4 * C + N + 4          # x0 / xm / ctx / contrib + score rows + max/p/denom
    bytes_per_lane_block = 128 * (2 * (rows_in + rows_out) * itemsize
                                  + rows_tmp_f32 * 4)
    max_blocks = max(1, vmem_budget_bytes // bytes_per_lane_block)

    n_blocks = -(-HW // 128)              # 128-lane blocks needed to cover HW

    if n_blocks <= max_blocks:
        if n_blocks >= 64 and HW % 256 == 0:
            # Large map that still fits: two equal lane-dense halves so both
            # v7x TensorCores get work.
            grid, tile = 2, HW // 2
        else:
            # Small map: one full-width block (no padding, no extra steps).
            grid, tile = 1, HW
        ragged = False
    else:
        tile_blocks = min(max_blocks, n_blocks)
        grid = -(-n_blocks // tile_blocks)
        tile_blocks = -(-n_blocks // grid)        # balance block sizes
        grid = -(-n_blocks // tile_blocks)        # last block starts in-bounds
        if grid % 2 == 1 and grid > 1:            # prefer an even grid (v7x megacore)
            tb2 = -(-n_blocks // (grid + 1))
            if -(-n_blocks // tb2) == grid + 1:
                grid, tile_blocks = grid + 1, tb2
        tile = tile_blocks * 128
        ragged = grid * tile != HW

    needed = (-(-tile // 128)) * bytes_per_lane_block
    vmem_limit = int(min(max(needed + (8 << 20), 24 << 20), 48 << 20))

    kernel = functools.partial(
        _attention_fusion_kernel,
        n_agents=N, feat_dim=C, inv_scale=1.0 / math.sqrt(C),
        hw=HW, tile=tile, ragged=ragged)

    out = pl.pallas_call(
        kernel,
        out_shape=jax.ShapeDtypeStruct((C, HW), x.dtype),
        grid_spec=pltpu.PrefetchScalarGridSpec(
            num_scalar_prefetch=0,
            grid=(grid,),
            in_specs=[pl.BlockSpec((N * C, tile), lambda i: (0, i))],
            out_specs=pl.BlockSpec((C, tile), lambda i: (0, i)),
        ),
        compiler_params=pltpu.CompilerParams(
            dimension_semantics=("parallel",),
            vmem_limit_bytes=vmem_limit),
    )(xf)

    return out.reshape(C, H, W)


def _reference(x):
    # Pure-JAX re-implementation of the PyTorch forward for verification.
    N, C, H, W = x.shape
    xf = x.reshape(N, C, H * W).transpose(2, 0, 1)             # (HW, N, C)
    score = jnp.einsum("bnc,bmc->bnm", xf, xf) / math.sqrt(C)  # (HW, N, N)
    attn = jax.nn.softmax(score, axis=-1)
    ctx = jnp.einsum("bnm,bmc->bnc", attn, xf)                 # (HW, N, C)
    return ctx.transpose(1, 2, 0).reshape(N, C, H, W)[0]


if __name__ == "__main__":
    key = jax.random.PRNGKey(0)

    # Primary toy shape from the module: exercises the single full-width block.
    cav_num, C, H, W = 2, 4, 16, 16
    x = jax.random.normal(key, (cav_num, C, H, W), dtype=jnp.float32)
    out = jax.block_until_ready(attention_fusion(x))
    ref = _reference(x)
    assert out.shape == (C, H, W)
    assert jnp.allclose(out, ref, atol=1e-4, rtol=1e-4), "mismatch vs reference"

    # Non-multiple-of-128 spatial size + 3 agents: full-width single block,
    # no wrapper padding anywhere.
    x2 = jax.random.normal(jax.random.PRNGKey(1), (3, 4, 20, 20), dtype=jnp.float32)
    out2 = jax.block_until_ready(attention_fusion(x2))
    ref2 = _reference(x2)
    assert out2.shape == (4, 20, 20)
    assert jnp.allclose(out2, ref2, atol=1e-4, rtol=1e-4), "mismatch (20x20 case)"

    # Tiny VMEM budget forces the multi-block (grid > 1) pipelined path.
    x3 = jax.random.normal(jax.random.PRNGKey(2), (2, 4, 16, 32), dtype=jnp.float32)
    out3 = jax.block_until_ready(attention_fusion(x3, vmem_budget_bytes=64 * 1024))
    ref3 = _reference(x3)
    assert jnp.allclose(out3, ref3, atol=1e-4, rtol=1e-4), "mismatch (multi-block case)"

    print("KERNEL_OK")
</pallas_src>

<mosaic_0001>
module attributes {stable_mosaic.version = 11 : i64} {
  func.func @_attention_fusion_kernel(%arg0: i32, %arg1: memref<8x256xf32, #tpu.memory_space<vmem>>, %arg2: memref<4x256xf32, #tpu.memory_space<vmem>>) attributes {dimension_semantics = [#tpu.dimension_semantics<parallel>], iteration_bounds = array<i64: 1>, scalar_prefetch = 0 : i64, scratch_operands = 0 : i64, tpu.core_type = #tpu.core_type<tc>, window_params = [{transform_indices = @transform_0, window_bounds = array<i64: 8, 256>}, {transform_indices = @transform_1, window_bounds = array<i64: 4, 256>}]} {
    %c0 = arith.constant 0 : index
    %c0_0 = arith.constant 0 : index
    %0 = vector.load %arg1[%c0, %c0_0] : memref<8x256xf32, #tpu.memory_space<vmem>>, vector<4x256xf32>
    %1 = arith.mulf %0, %0 : vector<4x256xf32>
    %cst = arith.constant dense<0.000000e+00> : vector<256xf32>
    %2 = vector.multi_reduction <add>, %1, %cst [0] : vector<4x256xf32> to vector<256xf32>
    %3 = vector.shape_cast %2 : vector<256xf32> to vector<1x256xf32>
    %cst_1 = arith.constant 5.000000e-01 : f32
    %4 = vector.broadcast %cst_1 : f32 to vector<1x256xf32>
    %5 = arith.mulf %3, %4 : vector<1x256xf32>
    %c4 = arith.constant 4 : index
    %c0_2 = arith.constant 0 : index
    %6 = vector.load %arg1[%c4, %c0_2] : memref<8x256xf32, #tpu.memory_space<vmem>>, vector<4x256xf32>
    %7 = arith.mulf %0, %6 : vector<4x256xf32>
    %cst_3 = arith.constant dense<0.000000e+00> : vector<256xf32>
    %8 = vector.multi_reduction <add>, %7, %cst_3 [0] : vector<4x256xf32> to vector<256xf32>
    %9 = vector.shape_cast %8 : vector<256xf32> to vector<1x256xf32>
    %cst_4 = arith.constant 5.000000e-01 : f32
    %10 = vector.broadcast %cst_4 : f32 to vector<1x256xf32>
    %11 = arith.mulf %9, %10 : vector<1x256xf32>
    %12 = arith.maximumf %5, %11 : vector<1x256xf32>
    %13 = arith.subf %5, %12 : vector<1x256xf32>
    %14 = math.exp %13 : vector<1x256xf32>
    %15 = vector.broadcast %14 : vector<1x256xf32> to vector<4x256xf32>
    %16 = arith.mulf %15, %0 : vector<4x256xf32>
    %17 = arith.subf %11, %12 : vector<1x256xf32>
    %18 = math.exp %17 : vector<1x256xf32>
    %19 = arith.addf %14, %18 : vector<1x256xf32>
    %c4_5 = arith.constant 4 : index
    %c0_6 = arith.constant 0 : index
    %20 = vector.load %arg1[%c4_5, %c0_6] : memref<8x256xf32, #tpu.memory_space<vmem>>, vector<4x256xf32>
    %21 = vector.broadcast %18 : vector<1x256xf32> to vector<4x256xf32>
    %22 = arith.mulf %21, %20 : vector<4x256xf32>
    %23 = arith.addf %16, %22 : vector<4x256xf32>
    %cst_7 = arith.constant 1.000000e+00 : f32
    %24 = vector.broadcast %cst_7 : f32 to vector<1x256xf32>
    %25 = arith.divf %24, %19 : vector<1x256xf32>
    %26 = vector.broadcast %25 : vector<1x256xf32> to vector<4x256xf32>
    %27 = arith.mulf %23, %26 : vector<4x256xf32>
    %c0_8 = arith.constant 0 : index
    %c0_9 = arith.constant 0 : index
    %28 = vector.load %arg2[%c0_8, %c0_9] : memref<4x256xf32, #tpu.memory_space<vmem>>, vector<4x256xf32>
    tpu.vector_store %arg2[%c0_8, %c0_9], %27 {strides = array<i32>} : memref<4x256xf32, #tpu.memory_space<vmem>>, vector<4x256xf32>,
    return
  }
  func.func @transform_0(%arg0: i32) -> (i32, i32) {
    %c0_i32 = arith.constant 0 : i32
    %c0_i32_0 = arith.constant 0 : i32
    return %c0_i32, %arg0 : i32, i32
  }
  func.func @transform_1(%arg0: i32) -> (i32, i32) {
    %c0_i32 = arith.constant 0 : i32
    %c0_i32_0 = arith.constant 0 : i32
    return %c0_i32, %arg0 : i32, i32
  }
}

</mosaic_0001>

<bundles_post_ra>
// kernel: tpu_custom_call.1
= control target key start
LH: loop header
LB: loop body
LE: loop exit
PB: predicated region body
PF: predicated region fallthrough
CT: control target
= control target key end

     0   :  { %6 = vsyncpa [#allocation3], 0  ;;  %s236_s0 = inlined_call_operand.hbm [shape: f32[8,256], index: 0, kind: input, shape index: {}]   ;;  %s237_s1 = inlined_call_operand.hbm [shape: f32[4,256], index: 1, kind: output, shape index: {}]  }
   0x1   :  { %7 = vsyncpa [#allocation4], 0  ;;  %s184_s6 = smov [#allocation2]   ;;  %s136_s10 = scalar_lea.hbm %s236_s0, 256 }
   0x2   :  { %s14_s7 = sshll.u32 %s184_s6, 4  ;;  %p137_p0 = scmp.ne.s32.totalorder %s236_s0, %s136_s10  ;;  %s15_s7 = int_to_ptr.vmem [resolvable:$true] %s14_s7 }
   0x3   :  { %p140_p1 = scmp.lt.u32.totalorder %s136_s10, %s236_s0 }
   0x5   :  { %p142_p2 = pnand %p140_p1, %p137_p0 }
   0x7   :  { %145 = shalt.err (!%p142_p2)
}
   0x8   :  { %s146_s15 = scalar_lea.vmem %s15_s7, 256  ;;  %p151_p4 = scmp.lt.s32.totalorder %s15_s7, %s15_s7 }
   0x9   :  { %p147_p3 = scmp.ne.s32.totalorder %s15_s7, %s146_s15  ;;  %p152_p5 = scmp.lt.s32.totalorder %s146_s15, %s146_s15 }
   0xb   :  { %p153_p6 = por %p152_p5, %p151_p4 }
   0xd   :  { %p154_p7 = pnand %p153_p6, %p147_p3 }
   0xf   :  { %157 = shalt.err (!%p154_p7)
}
  0x10   :  { %17 = dma.hbm_to_vmem [thread:$0]  %s236_s0, 256, %s15_s7, [#allocation3]  }
  0x11   :  { %180 = dma.done.wait [#allocation3], 256  }
  0x12   :  { %181 = vsyncadd [#allocation3], 4294967040  ;;  %vm25_vm0 = vcmask 1043456   ;;  %v208_v0 = vld [vmem:[#allocation2] sm:$0xf]  ;;  %s185_s0 = smov [#allocation5]  }
  0x13   :  { %v210_v1 = vld [vmem:[#allocation2 + $0x8] sm:$0xf]  ;;  %v42_v2 = vld [vmem:[#allocation2] sm:$0xf0]  ;;  %v23_v3 = vmul.f32 %v208_v0, %v208_v0  ;;  %v43_v5 = vld [vmem:[#allocation2 + $0x8] sm:$0xf0] }
  0x14   :  { %v24_v4 = vmul.f32 %v210_v1, %v210_v1  ;;  %v46_v6 = vrot.slane %v42_v2, 4  ;;  %v47_v7 = vrot.slane %v43_v5, 4  ;;  %s113_s18 = sshll.u32 %s185_s0, 4  ;;  %s114_s18 = int_to_ptr.vmem [resolvable:$true] %s113_s18 }
  0x15   :  { %v26_v8 = vsel %vm25_vm0, %v23_v3, 0.0  ;;  %s158_s19 = scalar_lea.vmem %s114_s18, 128  ;;  %p163_p9 = scmp.lt.s32.totalorder %s114_s18, %s114_s18 }
  0x16   :  { %v33_v9 = vsel %vm25_vm0, %v24_v4, 0.0  ;;  %v50_v10 = vmul.f32 %v46_v6, %v208_v0  ;;  %v27_v11 = vrot.slane %v26_v8, 4  ;;  %v51_v13 = vmul.f32 %v47_v7, %v210_v1  ;;  %p159_p8 = scmp.ne.s32.totalorder %s114_s18, %s158_s19  ;;  %p164_p10 = scmp.lt.s32.totalorder %s158_s19, %s158_s19 }
  0x17   :  { %v34_v12 = vrot.slane %v33_v9, 4 }
  0x18   :  { %v52_v14 = vsel %vm25_vm0, %v50_v10, 0.0  ;;  %v28_v15 = vadd.f32 %v27_v11, %v26_v8  ;;  %v59_v18 = vsel %vm25_vm0, %v51_v13, 0.0  ;;  %p165_p11 = por %p164_p10, %p163_p9 }
  0x19   :  { %v35_v16 = vadd.f32 %v34_v12, %v33_v9  ;;  %v53_v17 = vrot.slane %v52_v14, 4  ;;  %v60_v19 = vrot.slane %v59_v18, 4 }
  0x1a   :  { %v29_v20 = vrot.slane %v28_v15, 2  ;;  %p166_p12 = pnand %p165_p11, %p159_p8 }
  0x1b   :  { %v36_v21 = vrot.slane %v35_v16, 2  ;;  %v54_v22 = vadd.f32 %v53_v17, %v52_v14  ;;  %v61_v23 = vadd.f32 %v60_v19, %v59_v18 }
  0x1c   :  { %v30_v24 = vadd.f32 %v29_v20, %v28_v15 }
  0x1d   :  { %v37_v25 = vadd.f32 %v36_v21, %v35_v16  ;;  %v55_v26 = vrot.slane %v54_v22, 2  ;;  %v62_v27 = vrot.slane %v61_v23, 2 }
  0x1e   :  { %v31_v28 = vrot.slane %v30_v24, 1 }
  0x1f   :  { %v38_v29 = vrot.slane %v37_v25, 1  ;;  %v56_v30 = vadd.f32 %v55_v26, %v54_v22  ;;  %v63_v31 = vadd.f32 %v62_v27, %v61_v23 }
  0x20   :  { %v32_v32 = vadd.f32 %v31_v28, %v30_v24 }
  0x21   :  { %v39_v33 = vadd.f32 %v38_v29, %v37_v25  ;;  %v57_v34 = vrot.slane %v56_v30, 1  ;;  %v64_v35 = vrot.slane %v63_v31, 1 }
  0x22   :  { %v40_v36 = vmul.f32 0.5, %v32_v32 }
  0x23   :  { %v58_v37 = vadd.f32 %v57_v34, %v56_v30  ;;  %v41_v38 = vmul.f32 0.5, %v39_v33  ;;  %v65_v39 = vadd.f32 %v64_v35, %v63_v31 }
  0x25   :  { %v66_v40 = vmul.f32 0.5, %v58_v37  ;;  %v67_v41 = vmul.f32 0.5, %v65_v39 }
  0x27   :  { %v68_v42 = vmax.f32 %v40_v36, %v66_v40  ;;  %v69_v43 = vmax.f32 %v41_v38, %v67_v41 }
  0x29   :  { %v70_v44 = vsub.f32 %v40_v36, %v68_v42  ;;  %v78_v45 = vsub.f32 %v66_v40, %v68_v42  ;;  %v71_v46 = vsub.f32 %v41_v38, %v69_v43  ;;  %v79_v47 = vsub.f32 %v67_v41, %v69_v43 }
  0x2b   :  { %v72_v48 = vmul.f32 1.442695, %v70_v44  ;;  %v80_v49 = vmul.f32 1.442695, %v78_v45  ;;  %v74_v50 = vmul.f32 1.442695, %v71_v46 }
  0x2c   :  { %v82_v51 = vmul.f32 1.442695, %v79_v47 }
  0x2d   :  { %124 = vpow2.f32 %v72_v48 }
  0x2e   :  { %126 = vpow2.f32 %v74_v50 }
  0x2f   :  { %128 = vpow2.f32 %v80_v49 }
  0x30   :  { %130 = vpow2.f32 %v82_v51 }
  0x37   :  { %v125_v52 = vpop.eup %124 }
  0x38   :  { %v127_v53 = vpop.eup %126  ;;  %v76_v60 = vmul.f32 %v125_v52, %v208_v0 }
  0x39   :  { %v129_v54 = vpop.eup %128  ;;  %v77_v62 = vmul.f32 %v127_v53, %v210_v1 }
  0x3a   :  { %v131_v55 = vpop.eup %130  ;;  %v84_v56 = vadd.f32 %v129_v54, %v125_v52  ;;  %v86_v58 = vmul.f32 %v129_v54, %v42_v2 }
  0x3b   :  { %v85_v57 = vadd.f32 %v131_v55, %v127_v53  ;;  %v87_v59 = vmul.f32 %v131_v55, %v43_v5 }
  0x3c   :  { %132 = vrcp.f32 %v84_v56  ;;  %v90_v61 = vrot.slane %v86_v58, 4 }
  0x3d   :  { %134 = vrcp.f32 %v85_v57  ;;  %v91_v63 = vrot.slane %v87_v59, 4 }
  0x3e   :  { %v94_v3 = vadd.f32 %v90_v61, %v76_v60 }
  0x3f   :  { %v95_v4 = vadd.f32 %v91_v63, %v77_v62 }
  0x46   :  { %v133_v6 = vpop.eup %132 }
  0x47   :  { %v135_v7 = vpop.eup %134  ;;  %v100_v8 = vmul.f32 %v133_v6, %v94_v3 }
  0x48   :  { %v101_v9 = vmul.f32 %v135_v7, %v95_v4 }
  0x4a   :  { %v104_v10 = vcombine.low %v100_v8, %v101_v9 }
  0x4c   :  { %106 = vst [vmem:[#allocation5] sm:$0xff] %v104_v10 }
  0x4d   :  { %169 = shalt.err (!%p166_p12)
}
  0x4e   :  { %s170_s22 = scalar_lea.hbm %s237_s1, 128 }
  0x4f   :  { %p171_p13 = scmp.ne.s32.totalorder %s237_s1, %s170_s22  ;;  %p174_p0 = scmp.lt.u32.totalorder %s170_s22, %s237_s1 }
  0x51   :  { %p176_p1 = pnand %p174_p0, %p171_p13 }
  0x53   :  { %179 = shalt.err (!%p176_p1)
}
  0x54   :  { %116 = dma.vmem_to_hbm [thread:$0]  %s114_s18, 128, %s237_s1, [#allocation4]  }
  0x55   :  { %182 = dma.done.wait [#allocation4], 128  }
  0x56   :  { %183 = vsyncadd [#allocation4], 4294967168 }
  0x57   :  { %120 = vsyncpa [#allocation3], 1 }
  0x58   :  { %121 = vsyncpa [#allocation4], 1 }

</bundles_post_ra>
